<compile_context>
chip_gen: v6e
topology: v6e:2x2x1
jax: 0.10.0
libtpu: 0.0.40
codegen_flags: <defaults>
</compile_context>

<pallas_src>
import functools

import jax
import jax.numpy as jnp
from jax.experimental import pallas as pl
from jax.experimental.pallas import tpu as pltpu

_EPS = 1e-10


def _entropy_kernel(p_ref, ent_ref, bad_ref, *, n_rows, tiles_per_part,
                    needs_mask):
    part = pl.program_id(0)
    j = pl.program_id(1)

    @pl.when(j == 0)
    def _init():
        ent_ref[...] = jnp.zeros_like(ent_ref)
        bad_ref[...] = jnp.zeros_like(bad_ref)

    # Cast once; keep +eps / log / accumulation in f32 (1e-10 underflows bf16).
    p = p_ref[...].astype(jnp.float32)
    tn, c = p.shape

    contrib = -(p * jnp.log(p + _EPS))                 # VPU mul + EUP log
    bad = ((p < 0.0) | (p > 1.0)).astype(jnp.float32)  # device-side range check

    if needs_mask:
        # Global (unclamped) row index; rows >= n_rows belong to the partial
        # tail or to duplicated (clamped) tiles and must not contribute.
        tile_idx = part * tiles_per_part + j
        rows = tile_idx * tn + jax.lax.broadcasted_iota(jnp.int32, (tn, 1), 0)
        mask = rows < n_rows
        contrib = jnp.where(mask, contrib, 0.0)
        bad = jnp.where(mask, bad, 0.0)

    acc_rows = ent_ref.shape[0]
    if tn == acc_rows:                      # tiny inputs (N <= 8)
        ent_ref[...] += contrib
        bad_ref[...] += bad
    else:                                   # sublane-group fold, VPU adds only
        ent_ref[...] += contrib.reshape(tn // acc_rows, acc_rows, c).sum(axis=0)
        bad_ref[...] += bad.reshape(tn // acc_rows, acc_rows, c).sum(axis=0)


def _choose_tile_rows(n, c, itemsize, target_bytes=2 * 1024 * 1024):
    """~2 MiB tiles (multiple of 8 rows), capped at N."""
    if n <= 8:
        return n
    tn = max(8, target_bytes // max(1, c * itemsize))
    tn = min(tn, n)
    return max(8, (tn // 8) * 8)


def entropy_loss(probabilities, *, validate=True, tile_rows=None, num_parts=2):
    """Mean entropy of a (N, C) batch of probability vectors.

    validate=True (default) performs the device-side [0,1] range check and
    raises ValueError eagerly; under jit tracing the raise is skipped
    (use validate=False inside jitted code to avoid the host sync entirely).
    """
    p = jnp.asarray(probabilities)
    if p.ndim != 2:
        raise ValueError("Expected 2-D (N, C) probabilities.")
    n, c = p.shape

    tn = tile_rows if tile_rows is not None else _choose_tile_rows(
        n, c, p.dtype.itemsize)
    tn = min(tn, n)
    if tn >= 8:
        tn = (tn // 8) * 8
    num_tiles = pl.cdiv(n, tn)
    parts = num_parts if num_tiles >= num_parts else 1
    tiles_per_part = pl.cdiv(num_tiles, parts)
    acc_rows = 8 if (tn >= 8 and tn % 8 == 0) else tn
    needs_mask = (n % tn != 0) or (parts * tiles_per_part != num_tiles)

    if parts * tiles_per_part == num_tiles:
        def in_index(pi, j):
            return (pi * tiles_per_part + j, 0)
    else:
        def in_index(pi, j):
            # Clamp so duplicated trailing tiles (odd split across parts) stay
            # in bounds; their rows are masked out inside the kernel.
            return (jnp.minimum(pi * tiles_per_part + j, num_tiles - 1), 0)

    kernel = functools.partial(
        _entropy_kernel, n_rows=n, tiles_per_part=tiles_per_part,
        needs_mask=needs_mask)

    ent_partial, bad_partial = pl.pallas_call(
        kernel,
        out_shape=(
            jax.ShapeDtypeStruct((parts * acc_rows, c), jnp.float32),
            jax.ShapeDtypeStruct((parts * acc_rows, c), jnp.float32),
        ),
        grid_spec=pltpu.PrefetchScalarGridSpec(
            num_scalar_prefetch=0,
            grid=(parts, tiles_per_part),
            in_specs=[pl.BlockSpec((tn, c), in_index)],
            out_specs=(
                pl.BlockSpec((acc_rows, c), lambda pi, j: (pi, 0)),
                pl.BlockSpec((acc_rows, c), lambda pi, j: (pi, 0)),
            ),
        ),
        compiler_params=pltpu.CompilerParams(
            dimension_semantics=("parallel", "arbitrary"),
        ),
        cost_estimate=pl.CostEstimate(
            flops=5 * n * c,
            transcendentals=n * c,
            bytes_accessed=n * c * p.dtype.itemsize
            + 2 * parts * acc_rows * c * 4,
        ),
    )(p)

    loss = jnp.sum(ent_partial) / jnp.float32(n)

    if validate:
        n_bad = jnp.sum(bad_partial)
        try:
            has_bad = bool(n_bad > 0)
        except jax.errors.ConcretizationTypeError:
            # Under jit/vmap tracing we cannot raise eagerly.
            # TODO(synk): wire this through jax.experimental.checkify for an
            # in-jit range check.
            has_bad = False
        if has_bad:
            raise ValueError("Input probabilities must be in the range [0, 1].")

    return loss


if __name__ == "__main__":
    key = jax.random.PRNGKey(0)

    def ref_entropy(p):
        p = p.astype(jnp.float32)
        return jnp.mean(-jnp.sum(p * jnp.log(p + _EPS), axis=1))

    k1, k2 = jax.random.split(key)

    # 1) Small aligned case (single tile, single part).
    probs1 = jax.nn.softmax(
        jax.random.normal(k1, (8, 128), dtype=jnp.float32), axis=-1)
    loss1 = jax.block_until_ready(entropy_loss(probs1))
    assert jnp.allclose(loss1, ref_entropy(probs1), rtol=1e-5, atol=1e-5), (
        loss1, ref_entropy(probs1))

    # 2) Ragged case: 3 tiles split over 2 "parallel" parts -> clamped
    #    duplicate tile + partial-tail masking.
    probs2 = jax.nn.softmax(
        jax.random.normal(k2, (43, 128), dtype=jnp.float32), axis=-1)
    loss2 = jax.block_until_ready(entropy_loss(probs2, tile_rows=16))
    assert jnp.allclose(loss2, ref_entropy(probs2), rtol=1e-5, atol=1e-5), (
        loss2, ref_entropy(probs2))

    # 3) jit-compatible path (range check stays on device, no host raise).
    jit_loss = jax.jit(functools.partial(entropy_loss, validate=False,
                                         tile_rows=16))
    loss3 = jax.block_until_ready(jit_loss(probs2))
    assert jnp.allclose(loss3, ref_entropy(probs2), rtol=1e-5, atol=1e-5)

    # 4) Range-check semantics of the original module are preserved (eager).
    bad_probs = probs1.at[3, 7].set(1.5)
    raised = False
    try:
        entropy_loss(bad_probs)
    except ValueError:
        raised = True
    assert raised, "expected ValueError for out-of-range probabilities"

    print("KERNEL_OK")
</pallas_src>

<mosaic_0001>
module attributes {stable_mosaic.version = 11 : i64} {
  func.func @_entropy_kernel(%arg0: i32, %arg1: i32, %arg2: memref<8x128xf32, #tpu.memory_space<vmem>>, %arg3: memref<8x128xf32, #tpu.memory_space<vmem>>, %arg4: memref<8x128xf32, #tpu.memory_space<vmem>>) attributes {dimension_semantics = [#tpu.dimension_semantics<parallel>, #tpu.dimension_semantics<arbitrary>], iteration_bounds = array<i64: 1, 1>, scalar_prefetch = 0 : i64, scratch_operands = 0 : i64, tpu.core_type = #tpu.core_type<tc>, window_params = [{transform_indices = @transform_0, window_bounds = array<i64: 8, 128>}, {transform_indices = @transform_1, window_bounds = array<i64: 8, 128>}, {transform_indices = @transform_2, window_bounds = array<i64: 8, 128>}]} {
    %c0_i32 = arith.constant 0 : i32
    %0 = arith.cmpi eq, %arg1, %c0_i32 : i32
    %1 = arith.extui %0 : i1 to i32
    %c0_i32_0 = arith.constant 0 : i32
    %2 = arith.cmpi ne, %1, %c0_i32_0 : i32
    scf.if %2 {
      %cst_13 = arith.constant 0.000000e+00 : f32
      %23 = vector.broadcast %cst_13 : f32 to vector<8x128xf32>
      %c0_14 = arith.constant 0 : index
      %c0_15 = arith.constant 0 : index
      %24 = vector.load %arg3[%c0_14, %c0_15] : memref<8x128xf32, #tpu.memory_space<vmem>>, vector<8x128xf32>
      tpu.vector_store %arg3[%c0_14, %c0_15], %23 {strides = array<i32>} : memref<8x128xf32, #tpu.memory_space<vmem>>, vector<8x128xf32>,
      %cst_16 = arith.constant 0.000000e+00 : f32
      %25 = vector.broadcast %cst_16 : f32 to vector<8x128xf32>
      %c0_17 = arith.constant 0 : index
      %c0_18 = arith.constant 0 : index
      %26 = vector.load %arg4[%c0_17, %c0_18] : memref<8x128xf32, #tpu.memory_space<vmem>>, vector<8x128xf32>
      tpu.vector_store %arg4[%c0_17, %c0_18], %25 {strides = array<i32>} : memref<8x128xf32, #tpu.memory_space<vmem>>, vector<8x128xf32>,
    } else {
    }
    %c0 = arith.constant 0 : index
    %c0_1 = arith.constant 0 : index
    %3 = vector.load %arg2[%c0, %c0_1] : memref<8x128xf32, #tpu.memory_space<vmem>>, vector<8x128xf32>
    %cst = arith.constant 1.000000e-10 : f32
    %4 = vector.broadcast %cst : f32 to vector<8x128xf32>
    %5 = arith.addf %3, %4 : vector<8x128xf32>
    %6 = math.log %5 : vector<8x128xf32>
    %7 = arith.mulf %3, %6 : vector<8x128xf32>
    %cst_2 = arith.constant 0.000000e+00 : f32
    %8 = vector.broadcast %cst_2 : f32 to vector<8x128xf32>
    %9 = arith.subf %8, %7 : vector<8x128xf32>
    %cst_3 = arith.constant 0.000000e+00 : f32
    %10 = vector.broadcast %cst_3 : f32 to vector<8x128xf32>
    %11 = arith.cmpf olt, %3, %10 : vector<8x128xf32>
    %cst_4 = arith.constant 1.000000e+00 : f32
    %12 = vector.broadcast %cst_4 : f32 to vector<8x128xf32>
    %13 = arith.cmpf ogt, %3, %12 : vector<8x128xf32>
    %14 = arith.ori %11, %13 : vector<8x128xi1>
    %15 = arith.extui %14 : vector<8x128xi1> to vector<8x128xi32>
    %16 = arith.sitofp %15 : vector<8x128xi32> to vector<8x128xf32>
    %c0_5 = arith.constant 0 : index
    %c0_6 = arith.constant 0 : index
    %17 = vector.load %arg3[%c0_5, %c0_6] : memref<8x128xf32, #tpu.memory_space<vmem>>, vector<8x128xf32>
    %18 = arith.addf %17, %9 : vector<8x128xf32>
    %c0_7 = arith.constant 0 : index
    %c0_8 = arith.constant 0 : index
    %19 = vector.load %arg3[%c0_7, %c0_8] : memref<8x128xf32, #tpu.memory_space<vmem>>, vector<8x128xf32>
    tpu.vector_store %arg3[%c0_7, %c0_8], %18 {strides = array<i32>} : memref<8x128xf32, #tpu.memory_space<vmem>>, vector<8x128xf32>,
    %c0_9 = arith.constant 0 : index
    %c0_10 = arith.constant 0 : index
    %20 = vector.load %arg4[%c0_9, %c0_10] : memref<8x128xf32, #tpu.memory_space<vmem>>, vector<8x128xf32>
    %21 = arith.addf %20, %16 : vector<8x128xf32>
    %c0_11 = arith.constant 0 : index
    %c0_12 = arith.constant 0 : index
    %22 = vector.load %arg4[%c0_11, %c0_12] : memref<8x128xf32, #tpu.memory_space<vmem>>, vector<8x128xf32>
    tpu.vector_store %arg4[%c0_11, %c0_12], %21 {strides = array<i32>} : memref<8x128xf32, #tpu.memory_space<vmem>>, vector<8x128xf32>,
    return
  }
  func.func @transform_0(%arg0: i32, %arg1: i32) -> (i32, i32) {
    %c1_i32 = arith.constant 1 : i32
    %0 = arith.muli %arg0, %c1_i32 : i32
    %1 = arith.addi %0, %arg1 : i32
    %c0_i32 = arith.constant 0 : i32
    %c0_i32_0 = arith.constant 0 : i32
    return %1, %c0_i32 : i32, i32
  }
  func.func @transform_1(%arg0: i32, %arg1: i32) -> (i32, i32) {
    %c0_i32 = arith.constant 0 : i32
    %c0_i32_0 = arith.constant 0 : i32
    return %arg0, %c0_i32 : i32, i32
  }
  func.func @transform_2(%arg0: i32, %arg1: i32) -> (i32, i32) {
    %c0_i32 = arith.constant 0 : i32
    %c0_i32_0 = arith.constant 0 : i32
    return %arg0, %c0_i32 : i32, i32
  }
}

</mosaic_0001>

<bundles_post_ra>
// kernel: tpu_custom_call.1
= control target key start
LH: loop header
LB: loop body
LE: loop exit
PB: predicated region body
PF: predicated region fallthrough
CT: control target
= control target key end

     0   :  { %8 = vsyncpa [#allocation3], 0  ;;  %s181_s0 = inlined_call_operand.hbm [shape: f32[8,128], index: 0, kind: input, shape index: {}]   ;;  %s182_s1 = inlined_call_operand.hbm [shape: f32[8,128], index: 1, kind: output, shape index: {0}]   ;;  %s183_s2 = inlined_call_operand.hbm [shape: f32[8,128], index: 2, kind: output, shape index: {1}]  }
   0x1   :  { %9 = vsyncpa [#allocation4], 0 }
   0x2   :  { %10 = vsyncpa [#allocation7], 0  ;;  %s153_s9 = smov [#allocation2]  }
   0x3   :  { %s20_s10 = sshll.u32 %s153_s9, 4  ;;  %s21_s10 = int_to_ptr.vmem [resolvable:$true] %s20_s10 }
   0x4   :  { %s95_s11 = scalar_lea.vmem %s21_s10, 128  ;;  %p100_p1 = scmp.lt.s32.totalorder %s21_s10, %s21_s10 }
   0x5   :  { %p96_p0 = scmp.ne.s32.totalorder %s21_s10, %s95_s11  ;;  %p101_p2 = scmp.lt.s32.totalorder %s95_s11, %s95_s11 }
   0x7   :  { %p102_p3 = por %p101_p2, %p100_p1 }
   0x9   :  { %p103_p4 = pnand %p102_p3, %p96_p0 }
   0xb   :  { %106 = shalt.err (!%p103_p4)
}
   0xc   :  { %23 = dma.hbm_to_vmem [thread:$0]  %s181_s0, 128, %s21_s10, [#allocation3]  }
   0xd   :  { %147 = dma.done.wait [#allocation3], 128  }
   0xe   :  { %148 = vsyncadd [#allocation3], 4294967168  ;;  %v34_v0 = vld [vmem:[#allocation2] sm:$0xff]  ;;  %s154_s14 = smov [#allocation6]   ;;  %v155_v2 = vmov 0.0  }
   0xf   :  { %vm40_vm0 = vcmp.lt.f32.partialorder %v34_v0, 0.0  ;;  %vm41_vm1 = vcmp.gt.f32.partialorder %v34_v0, 1.0  ;;  %v35_v1 = vadd.f32 1e-10, %v34_v0  ;;  %s67_s15 = sshll.u32 %s154_s14, 4  ;;  %s68_s15 = int_to_ptr.vmem [resolvable:$true] %s67_s15 }
  0x10   :  { %vm42_vm2 = vmor %vm40_vm0, %vm41_vm1  ;;  %s107_s16 = scalar_lea.vmem %s68_s15, 128  ;;  %p112_p6 = scmp.lt.s32.totalorder %s68_s15, %s68_s15 }
  0x11   :  { %v80_v3 = vsel %vm42_vm2, 1.0, %v155_v2  ;;  %85 = vlog2.f32 %v35_v1  ;;  %p108_p5 = scmp.ne.s32.totalorder %s68_s15, %s107_s16  ;;  %p113_p7 = scmp.lt.s32.totalorder %s107_s16, %s107_s16 }
  0x12   :  { %50 = vst [vmem:[#allocation6] sm:$0xff] %v80_v3 }
  0x13   :  { %p114_p8 = por %p113_p7, %p112_p6 }
  0x15   :  { %p115_p9 = pnand %p114_p8, %p108_p5 }
  0x17   :  { %118 = shalt.err (!%p115_p9)
}
  0x18   :  { %70 = dma.vmem_to_hbm [thread:$0]  %s68_s15, 128, %s183_s2, [#allocation7]  }
  0x19   :  { %s156_s18 = smov [#allocation5]  }
  0x1a   :  { %s57_s19 = sshll.u32 %s156_s18, 4  ;;  %s58_s19 = int_to_ptr.vmem [resolvable:$true] %s57_s19 }
  0x1b   :  { %s127_s20 = scalar_lea.vmem %s58_s19, 128  ;;  %p132_p11 = scmp.lt.s32.totalorder %s58_s19, %s58_s19 }
  0x1c   :  { %p128_p10 = scmp.ne.s32.totalorder %s58_s19, %s127_s20  ;;  %p133_p12 = scmp.lt.s32.totalorder %s127_s20, %s127_s20 }
  0x1e   :  { %v86_v4 = vpop.eup %85  ;;  %p134_p13 = por %p133_p12, %p132_p11 }
  0x1f   :  { %v37_v5 = vmul.f32 0.6931472, %v86_v4 }
  0x20   :  { %p135_p0 = pnand %p134_p13, %p128_p10 }
  0x21   :  { %v38_v6 = vmul.f32 %v37_v5, %v34_v0 }
  0x23   :  { %v39_v7 = vsub.f32 0.0, %v38_v6 }
  0x25   :  { %47 = vst [vmem:[#allocation5] sm:$0xff] %v39_v7 }
  0x26   :  { %138 = shalt.err (!%p135_p0)
}
  0x27   :  { %60 = dma.vmem_to_hbm [thread:$0]  %s58_s19, 128, %s182_s1, [#allocation4]  }
  0x28   :  { %149 = dma.done.wait [#allocation4], 128  }
  0x29   :  { %150 = vsyncadd [#allocation4], 4294967168 }
  0x2a   :  { %151 = dma.done.wait [#allocation7], 128  }
  0x2b   :  { %152 = vsyncadd [#allocation7], 4294967168 }
  0x2c   :  { %77 = vsyncpa [#allocation3], 1 }
  0x2d   :  { %78 = vsyncpa [#allocation4], 1 }
  0x2e   :  { %79 = vsyncpa [#allocation7], 1 }

</bundles_post_ra>
